<compile_context>
chip_gen: v5e
topology: v5e:2x2
jax: 0.10.0
libtpu: 0.0.40
codegen_flags: <defaults>
</compile_context>

<pallas_src>
import functools

import jax
import jax.numpy as jnp
from jax.experimental import pallas as pl
from jax.experimental.pallas import tpu as pltpu


def _round_up(x: int, m: int) -> int:
    return ((x + m - 1) // m) * m


def _gather_kernel(ids_smem, raw_ids_ref, emb_hbm, out_ref, sem, *,
                   tokens_per_step: int, vocab: int):
    """One grid step: gather `tokens_per_step` table rows straight into the
    (T, D) output VMEM block via manual row DMAs, then zero rows whose raw id
    is out of range (matching the reference one-hot semantics)."""
    step = pl.program_id(0)
    base = step * tokens_per_step

    # Phase 1: issue all T row DMAs (HBM table row -> output VMEM row).
    # Fully unrolled (T is static) so the DMA engine stays saturated and the
    # scalar issue code schedules tightly.
    copies = []
    for t in range(tokens_per_step):
        row = ids_smem[base + t]                       # clamped, never OOB
        cp = pltpu.make_async_copy(
            emb_hbm.at[pl.ds(row, 1), :],
            out_ref.at[pl.ds(t, 1), :],
            sem,
        )
        cp.start()
        copies.append(cp)

    # Phase 2: wait for all of them (equal-sized copies share one DMA sem).
    for cp in copies:
        cp.wait()

    # Phase 3: in-kernel OOB zeroing — a compare + select on data already in
    # VMEM, instead of a second XLA pass over the whole (n, D) result.
    raw = raw_ids_ref[...]                             # (T, 1) int32
    valid = (raw >= 0) & (raw < vocab)
    out_ref[...] = jnp.where(valid, out_ref[...],
                             jnp.zeros((), dtype=out_ref.dtype))


@jax.jit
def embedding_forward(x, embeddings):
    """x: int array of arbitrary shape (...); embeddings: (V, D).

    Returns (..., D) with embeddings.dtype, matching the PyTorch module's
    one-hot einsum semantics (out-of-range ids -> all-zero rows).
    """
    vocab, dim = embeddings.shape
    orig_shape = x.shape
    flat = x.reshape(-1).astype(jnp.int32)
    n = flat.shape[0]

    item = embeddings.dtype.itemsize
    sub = {4: 8, 2: 16, 1: 32}.get(item, 8)            # sublane multiple by dtype

    # Tokens per grid step: large enough to amortize per-step overhead and keep
    # hundreds of row DMAs in flight, small enough that the double-buffered
    # (T, D) output block stays well inside v7x's 64 MiB VMEM.
    t_cap_code = 256                                    # unrolled DMA issue loop
    t_cap_vmem = max(sub, (8 * 1024 * 1024) // max(1, dim * item))
    tokens = min(t_cap_code, t_cap_vmem, _round_up(n, sub))
    tokens = max(sub, (tokens // sub) * sub)

    n_pad = _round_up(n, tokens)
    n_steps = n_pad // tokens

    # Clamp before the kernel so the row DMA never reads out of bounds; the
    # raw ids travel alongside (as a tiny (n_pad, 1) VMEM input) so the kernel
    # can zero invalid rows itself.
    ids_safe = jnp.pad(jnp.clip(flat, 0, vocab - 1), (0, n_pad - n))
    ids_raw = jnp.pad(flat, (0, n_pad - n)).reshape(n_pad, 1)

    kernel = functools.partial(_gather_kernel,
                               tokens_per_step=tokens, vocab=vocab)

    out_bytes = n_pad * dim * item
    cost = pl.CostEstimate(
        flops=0,
        transcendentals=0,
        bytes_accessed=2 * out_bytes + n_pad * 8,       # rows read + out write + ids
    )

    # Double-buffered (T, D) output + (T, 1) ids blocks, with headroom; keep it
    # above v5e's 16 MiB scoped default and below v7x's 64 MiB physical VMEM.
    vmem_need = 2 * (tokens * dim * item + tokens * 4)
    vmem_budget = int(min(64 * 1024 * 1024,
                          max(16 * 1024 * 1024, 2 * vmem_need)))

    out = pl.pallas_call(
        kernel,
        out_shape=jax.ShapeDtypeStruct((n_pad, dim), embeddings.dtype),
        grid_spec=pltpu.PrefetchScalarGridSpec(
            num_scalar_prefetch=1,
            grid=(n_steps,),
            in_specs=[
                # raw ids for the in-kernel validity mask (tiny VMEM block)
                pl.BlockSpec((tokens, 1), lambda i, ids: (i, 0)),
                # embedding table stays in HBM; gathered via manual row DMAs
                pl.BlockSpec(memory_space=pl.ANY),
            ],
            out_specs=pl.BlockSpec((tokens, dim), lambda i, ids: (i, 0)),
            scratch_shapes=[pltpu.SemaphoreType.DMA],
        ),
        compiler_params=pltpu.CompilerParams(
            # Independent token axis -> shard across both TCs on v7x.
            dimension_semantics=("parallel",),
            vmem_limit_bytes=vmem_budget,
        ),
        cost_estimate=cost,
    )(ids_safe, ids_raw, embeddings)

    out = out[:n]
    return out.reshape(*orig_shape, dim)


if __name__ == "__main__":
    vocab_size = 64
    embedding_dim = 32
    batch, seq = 2, 8

    key = jax.random.PRNGKey(0)
    k_emb, k_ids = jax.random.split(key)

    # deterministic parameter init: trunc_normal_(mean=0, std=1, a=-3, b=3)
    embeddings = jax.random.truncated_normal(
        k_emb, -3.0, 3.0, (vocab_size, embedding_dim), dtype=jnp.float32)

    x = jax.random.randint(k_ids, (batch, seq), 0, vocab_size, dtype=jnp.int32)
    # include one out-of-range id to exercise the one-hot "OOB -> zero row" path
    x = x.at[0, 0].set(vocab_size + 3)

    out = embedding_forward(x, embeddings)
    out = jax.block_until_ready(out)

    # reference: exact one-hot einsum semantics of the PyTorch module
    onehot = (x[..., None] == jnp.arange(vocab_size)).astype(embeddings.dtype)
    ref = jnp.einsum('bsv,vd->bsd', onehot, embeddings)

    assert out.shape == (batch, seq, embedding_dim)
    assert jnp.allclose(out, ref), "mismatch vs one-hot reference"

    print("KERNEL_OK")
</pallas_src>

<mosaic_0001>
module attributes {stable_mosaic.version = 11 : i64} {
  func.func @_gather_kernel(%arg0: i32, %arg1: memref<16xi32, #tpu.memory_space<smem>>, %arg2: memref<16x1xi32, #tpu.memory_space<vmem>>, %arg3: memref<64x32xf32, #tpu.memory_space<any>>, %arg4: memref<16x32xf32, #tpu.memory_space<vmem>>, %arg5: memref<!tpu.dma_semaphore, #tpu.memory_space<semaphore_mem>>) attributes {dimension_semantics = [#tpu.dimension_semantics<parallel>], iteration_bounds = array<i64: 1>, scalar_prefetch = 1 : i64, scratch_operands = 1 : i64, tpu.core_type = #tpu.core_type<tc>, window_params = [{transform_indices = @transform_0, window_bounds = array<i64: 16, 1>}, {}, {transform_indices = @transform_2, window_bounds = array<i64: 16, 32>}]} {
    %c16_i32 = arith.constant 16 : i32
    %0 = arith.muli %arg0, %c16_i32 : i32
    %c0_i32 = arith.constant 0 : i32
    %1 = arith.addi %0, %c0_i32 : i32
    %2 = arith.index_cast %1 : i32 to index
    %3 = memref.load %arg1[%2] : memref<16xi32, #tpu.memory_space<smem>>
    %c0_i32_0 = arith.constant 0 : i32
    %4 = tpu.memref_slice %arg3[%3, %c0_i32_0] : memref<64x32xf32, #tpu.memory_space<any>> -> memref<1x32xf32, #tpu.memory_space<any>>
    %c0_i32_1 = arith.constant 0 : i32
    %c0_i32_2 = arith.constant 0 : i32
    %5 = tpu.memref_slice %arg4[%c0_i32_1, %c0_i32_2] : memref<16x32xf32, #tpu.memory_space<vmem>> -> memref<1x32xf32, #tpu.memory_space<vmem>>
    tpu.enqueue_dma source(%4 : memref<1x32xf32, #tpu.memory_space<any>>) target(%5 : memref<1x32xf32, #tpu.memory_space<vmem>>) target_semaphore(%arg5 : memref<!tpu.dma_semaphore, #tpu.memory_space<semaphore_mem>>)
    %c1_i32 = arith.constant 1 : i32
    %6 = arith.addi %0, %c1_i32 : i32
    %7 = arith.index_cast %6 : i32 to index
    %8 = memref.load %arg1[%7] : memref<16xi32, #tpu.memory_space<smem>>
    %c0_i32_3 = arith.constant 0 : i32
    %9 = tpu.memref_slice %arg3[%8, %c0_i32_3] : memref<64x32xf32, #tpu.memory_space<any>> -> memref<1x32xf32, #tpu.memory_space<any>>
    %c1_i32_4 = arith.constant 1 : i32
    %c0_i32_5 = arith.constant 0 : i32
    %10 = tpu.memref_slice %arg4[%c1_i32_4, %c0_i32_5] : memref<16x32xf32, #tpu.memory_space<vmem>> -> memref<1x32xf32, #tpu.memory_space<vmem>>
    tpu.enqueue_dma source(%9 : memref<1x32xf32, #tpu.memory_space<any>>) target(%10 : memref<1x32xf32, #tpu.memory_space<vmem>>) target_semaphore(%arg5 : memref<!tpu.dma_semaphore, #tpu.memory_space<semaphore_mem>>)
    %c2_i32 = arith.constant 2 : i32
    %11 = arith.addi %0, %c2_i32 : i32
    %12 = arith.index_cast %11 : i32 to index
    %13 = memref.load %arg1[%12] : memref<16xi32, #tpu.memory_space<smem>>
    %c0_i32_6 = arith.constant 0 : i32
    %14 = tpu.memref_slice %arg3[%13, %c0_i32_6] : memref<64x32xf32, #tpu.memory_space<any>> -> memref<1x32xf32, #tpu.memory_space<any>>
    %c2_i32_7 = arith.constant 2 : i32
    %c0_i32_8 = arith.constant 0 : i32
    %15 = tpu.memref_slice %arg4[%c2_i32_7, %c0_i32_8] : memref<16x32xf32, #tpu.memory_space<vmem>> -> memref<1x32xf32, #tpu.memory_space<vmem>>
    tpu.enqueue_dma source(%14 : memref<1x32xf32, #tpu.memory_space<any>>) target(%15 : memref<1x32xf32, #tpu.memory_space<vmem>>) target_semaphore(%arg5 : memref<!tpu.dma_semaphore, #tpu.memory_space<semaphore_mem>>)
    %c3_i32 = arith.constant 3 : i32
    %16 = arith.addi %0, %c3_i32 : i32
    %17 = arith.index_cast %16 : i32 to index
    %18 = memref.load %arg1[%17] : memref<16xi32, #tpu.memory_space<smem>>
    %c0_i32_9 = arith.constant 0 : i32
    %19 = tpu.memref_slice %arg3[%18, %c0_i32_9] : memref<64x32xf32, #tpu.memory_space<any>> -> memref<1x32xf32, #tpu.memory_space<any>>
    %c3_i32_10 = arith.constant 3 : i32
    %c0_i32_11 = arith.constant 0 : i32
    %20 = tpu.memref_slice %arg4[%c3_i32_10, %c0_i32_11] : memref<16x32xf32, #tpu.memory_space<vmem>> -> memref<1x32xf32, #tpu.memory_space<vmem>>
    tpu.enqueue_dma source(%19 : memref<1x32xf32, #tpu.memory_space<any>>) target(%20 : memref<1x32xf32, #tpu.memory_space<vmem>>) target_semaphore(%arg5 : memref<!tpu.dma_semaphore, #tpu.memory_space<semaphore_mem>>)
    %c4_i32 = arith.constant 4 : i32
    %21 = arith.addi %0, %c4_i32 : i32
    %22 = arith.index_cast %21 : i32 to index
    %23 = memref.load %arg1[%22] : memref<16xi32, #tpu.memory_space<smem>>
    %c0_i32_12 = arith.constant 0 : i32
    %24 = tpu.memref_slice %arg3[%23, %c0_i32_12] : memref<64x32xf32, #tpu.memory_space<any>> -> memref<1x32xf32, #tpu.memory_space<any>>
    %c4_i32_13 = arith.constant 4 : i32
    %c0_i32_14 = arith.constant 0 : i32
    %25 = tpu.memref_slice %arg4[%c4_i32_13, %c0_i32_14] : memref<16x32xf32, #tpu.memory_space<vmem>> -> memref<1x32xf32, #tpu.memory_space<vmem>>
    tpu.enqueue_dma source(%24 : memref<1x32xf32, #tpu.memory_space<any>>) target(%25 : memref<1x32xf32, #tpu.memory_space<vmem>>) target_semaphore(%arg5 : memref<!tpu.dma_semaphore, #tpu.memory_space<semaphore_mem>>)
    %c5_i32 = arith.constant 5 : i32
    %26 = arith.addi %0, %c5_i32 : i32
    %27 = arith.index_cast %26 : i32 to index
    %28 = memref.load %arg1[%27] : memref<16xi32, #tpu.memory_space<smem>>
    %c0_i32_15 = arith.constant 0 : i32
    %29 = tpu.memref_slice %arg3[%28, %c0_i32_15] : memref<64x32xf32, #tpu.memory_space<any>> -> memref<1x32xf32, #tpu.memory_space<any>>
    %c5_i32_16 = arith.constant 5 : i32
    %c0_i32_17 = arith.constant 0 : i32
    %30 = tpu.memref_slice %arg4[%c5_i32_16, %c0_i32_17] : memref<16x32xf32, #tpu.memory_space<vmem>> -> memref<1x32xf32, #tpu.memory_space<vmem>>
    tpu.enqueue_dma source(%29 : memref<1x32xf32, #tpu.memory_space<any>>) target(%30 : memref<1x32xf32, #tpu.memory_space<vmem>>) target_semaphore(%arg5 : memref<!tpu.dma_semaphore, #tpu.memory_space<semaphore_mem>>)
    %c6_i32 = arith.constant 6 : i32
    %31 = arith.addi %0, %c6_i32 : i32
    %32 = arith.index_cast %31 : i32 to index
    %33 = memref.load %arg1[%32] : memref<16xi32, #tpu.memory_space<smem>>
    %c0_i32_18 = arith.constant 0 : i32
    %34 = tpu.memref_slice %arg3[%33, %c0_i32_18] : memref<64x32xf32, #tpu.memory_space<any>> -> memref<1x32xf32, #tpu.memory_space<any>>
    %c6_i32_19 = arith.constant 6 : i32
    %c0_i32_20 = arith.constant 0 : i32
    %35 = tpu.memref_slice %arg4[%c6_i32_19, %c0_i32_20] : memref<16x32xf32, #tpu.memory_space<vmem>> -> memref<1x32xf32, #tpu.memory_space<vmem>>
    tpu.enqueue_dma source(%34 : memref<1x32xf32, #tpu.memory_space<any>>) target(%35 : memref<1x32xf32, #tpu.memory_space<vmem>>) target_semaphore(%arg5 : memref<!tpu.dma_semaphore, #tpu.memory_space<semaphore_mem>>)
    %c7_i32 = arith.constant 7 : i32
    %36 = arith.addi %0, %c7_i32 : i32
    %37 = arith.index_cast %36 : i32 to index
    %38 = memref.load %arg1[%37] : memref<16xi32, #tpu.memory_space<smem>>
    %c0_i32_21 = arith.constant 0 : i32
    %39 = tpu.memref_slice %arg3[%38, %c0_i32_21] : memref<64x32xf32, #tpu.memory_space<any>> -> memref<1x32xf32, #tpu.memory_space<any>>
    %c7_i32_22 = arith.constant 7 : i32
    %c0_i32_23 = arith.constant 0 : i32
    %40 = tpu.memref_slice %arg4[%c7_i32_22, %c0_i32_23] : memref<16x32xf32, #tpu.memory_space<vmem>> -> memref<1x32xf32, #tpu.memory_space<vmem>>
    tpu.enqueue_dma source(%39 : memref<1x32xf32, #tpu.memory_space<any>>) target(%40 : memref<1x32xf32, #tpu.memory_space<vmem>>) target_semaphore(%arg5 : memref<!tpu.dma_semaphore, #tpu.memory_space<semaphore_mem>>)
    %c8_i32 = arith.constant 8 : i32
    %41 = arith.addi %0, %c8_i32 : i32
    %42 = arith.index_cast %41 : i32 to index
    %43 = memref.load %arg1[%42] : memref<16xi32, #tpu.memory_space<smem>>
    %c0_i32_24 = arith.constant 0 : i32
    %44 = tpu.memref_slice %arg3[%43, %c0_i32_24] : memref<64x32xf32, #tpu.memory_space<any>> -> memref<1x32xf32, #tpu.memory_space<any>>
    %c8_i32_25 = arith.constant 8 : i32
    %c0_i32_26 = arith.constant 0 : i32
    %45 = tpu.memref_slice %arg4[%c8_i32_25, %c0_i32_26] : memref<16x32xf32, #tpu.memory_space<vmem>> -> memref<1x32xf32, #tpu.memory_space<vmem>>
    tpu.enqueue_dma source(%44 : memref<1x32xf32, #tpu.memory_space<any>>) target(%45 : memref<1x32xf32, #tpu.memory_space<vmem>>) target_semaphore(%arg5 : memref<!tpu.dma_semaphore, #tpu.memory_space<semaphore_mem>>)
    %c9_i32 = arith.constant 9 : i32
    %46 = arith.addi %0, %c9_i32 : i32
    %47 = arith.index_cast %46 : i32 to index
    %48 = memref.load %arg1[%47] : memref<16xi32, #tpu.memory_space<smem>>
    %c0_i32_27 = arith.constant 0 : i32
    %49 = tpu.memref_slice %arg3[%48, %c0_i32_27] : memref<64x32xf32, #tpu.memory_space<any>> -> memref<1x32xf32, #tpu.memory_space<any>>
    %c9_i32_28 = arith.constant 9 : i32
    %c0_i32_29 = arith.constant 0 : i32
    %50 = tpu.memref_slice %arg4[%c9_i32_28, %c0_i32_29] : memref<16x32xf32, #tpu.memory_space<vmem>> -> memref<1x32xf32, #tpu.memory_space<vmem>>
    tpu.enqueue_dma source(%49 : memref<1x32xf32, #tpu.memory_space<any>>) target(%50 : memref<1x32xf32, #tpu.memory_space<vmem>>) target_semaphore(%arg5 : memref<!tpu.dma_semaphore, #tpu.memory_space<semaphore_mem>>)
    %c10_i32 = arith.constant 10 : i32
    %51 = arith.addi %0, %c10_i32 : i32
    %52 = arith.index_cast %51 : i32 to index
    %53 = memref.load %arg1[%52] : memref<16xi32, #tpu.memory_space<smem>>
    %c0_i32_30 = arith.constant 0 : i32
    %54 = tpu.memref_slice %arg3[%53, %c0_i32_30] : memref<64x32xf32, #tpu.memory_space<any>> -> memref<1x32xf32, #tpu.memory_space<any>>
    %c10_i32_31 = arith.constant 10 : i32
    %c0_i32_32 = arith.constant 0 : i32
    %55 = tpu.memref_slice %arg4[%c10_i32_31, %c0_i32_32] : memref<16x32xf32, #tpu.memory_space<vmem>> -> memref<1x32xf32, #tpu.memory_space<vmem>>
    tpu.enqueue_dma source(%54 : memref<1x32xf32, #tpu.memory_space<any>>) target(%55 : memref<1x32xf32, #tpu.memory_space<vmem>>) target_semaphore(%arg5 : memref<!tpu.dma_semaphore, #tpu.memory_space<semaphore_mem>>)
    %c11_i32 = arith.constant 11 : i32
    %56 = arith.addi %0, %c11_i32 : i32
    %57 = arith.index_cast %56 : i32 to index
    %58 = memref.load %arg1[%57] : memref<16xi32, #tpu.memory_space<smem>>
    %c0_i32_33 = arith.constant 0 : i32
    %59 = tpu.memref_slice %arg3[%58, %c0_i32_33] : memref<64x32xf32, #tpu.memory_space<any>> -> memref<1x32xf32, #tpu.memory_space<any>>
    %c11_i32_34 = arith.constant 11 : i32
    %c0_i32_35 = arith.constant 0 : i32
    %60 = tpu.memref_slice %arg4[%c11_i32_34, %c0_i32_35] : memref<16x32xf32, #tpu.memory_space<vmem>> -> memref<1x32xf32, #tpu.memory_space<vmem>>
    tpu.enqueue_dma source(%59 : memref<1x32xf32, #tpu.memory_space<any>>) target(%60 : memref<1x32xf32, #tpu.memory_space<vmem>>) target_semaphore(%arg5 : memref<!tpu.dma_semaphore, #tpu.memory_space<semaphore_mem>>)
    %c12_i32 = arith.constant 12 : i32
    %61 = arith.addi %0, %c12_i32 : i32
    %62 = arith.index_cast %61 : i32 to index
    %63 = memref.load %arg1[%62] : memref<16xi32, #tpu.memory_space<smem>>
    %c0_i32_36 = arith.constant 0 : i32
    %64 = tpu.memref_slice %arg3[%63, %c0_i32_36] : memref<64x32xf32, #tpu.memory_space<any>> -> memref<1x32xf32, #tpu.memory_space<any>>
    %c12_i32_37 = arith.constant 12 : i32
    %c0_i32_38 = arith.constant 0 : i32
    %65 = tpu.memref_slice %arg4[%c12_i32_37, %c0_i32_38] : memref<16x32xf32, #tpu.memory_space<vmem>> -> memref<1x32xf32, #tpu.memory_space<vmem>>
    tpu.enqueue_dma source(%64 : memref<1x32xf32, #tpu.memory_space<any>>) target(%65 : memref<1x32xf32, #tpu.memory_space<vmem>>) target_semaphore(%arg5 : memref<!tpu.dma_semaphore, #tpu.memory_space<semaphore_mem>>)
    %c13_i32 = arith.constant 13 : i32
    %66 = arith.addi %0, %c13_i32 : i32
    %67 = arith.index_cast %66 : i32 to index
    %68 = memref.load %arg1[%67] : memref<16xi32, #tpu.memory_space<smem>>
    %c0_i32_39 = arith.constant 0 : i32
    %69 = tpu.memref_slice %arg3[%68, %c0_i32_39] : memref<64x32xf32, #tpu.memory_space<any>> -> memref<1x32xf32, #tpu.memory_space<any>>
    %c13_i32_40 = arith.constant 13 : i32
    %c0_i32_41 = arith.constant 0 : i32
    %70 = tpu.memref_slice %arg4[%c13_i32_40, %c0_i32_41] : memref<16x32xf32, #tpu.memory_space<vmem>> -> memref<1x32xf32, #tpu.memory_space<vmem>>
    tpu.enqueue_dma source(%69 : memref<1x32xf32, #tpu.memory_space<any>>) target(%70 : memref<1x32xf32, #tpu.memory_space<vmem>>) target_semaphore(%arg5 : memref<!tpu.dma_semaphore, #tpu.memory_space<semaphore_mem>>)
    %c14_i32 = arith.constant 14 : i32
    %71 = arith.addi %0, %c14_i32 : i32
    %72 = arith.index_cast %71 : i32 to index
    %73 = memref.load %arg1[%72] : memref<16xi32, #tpu.memory_space<smem>>
    %c0_i32_42 = arith.constant 0 : i32
    %74 = tpu.memref_slice %arg3[%73, %c0_i32_42] : memref<64x32xf32, #tpu.memory_space<any>> -> memref<1x32xf32, #tpu.memory_space<any>>
    %c14_i32_43 = arith.constant 14 : i32
    %c0_i32_44 = arith.constant 0 : i32
    %75 = tpu.memref_slice %arg4[%c14_i32_43, %c0_i32_44] : memref<16x32xf32, #tpu.memory_space<vmem>> -> memref<1x32xf32, #tpu.memory_space<vmem>>
    tpu.enqueue_dma source(%74 : memref<1x32xf32, #tpu.memory_space<any>>) target(%75 : memref<1x32xf32, #tpu.memory_space<vmem>>) target_semaphore(%arg5 : memref<!tpu.dma_semaphore, #tpu.memory_space<semaphore_mem>>)
    %c15_i32 = arith.constant 15 : i32
    %76 = arith.addi %0, %c15_i32 : i32
    %77 = arith.index_cast %76 : i32 to index
    %78 = memref.load %arg1[%77] : memref<16xi32, #tpu.memory_space<smem>>
    %c0_i32_45 = arith.constant 0 : i32
    %79 = tpu.memref_slice %arg3[%78, %c0_i32_45] : memref<64x32xf32, #tpu.memory_space<any>> -> memref<1x32xf32, #tpu.memory_space<any>>
    %c15_i32_46 = arith.constant 15 : i32
    %c0_i32_47 = arith.constant 0 : i32
    %80 = tpu.memref_slice %arg4[%c15_i32_46, %c0_i32_47] : memref<16x32xf32, #tpu.memory_space<vmem>> -> memref<1x32xf32, #tpu.memory_space<vmem>>
    tpu.enqueue_dma source(%79 : memref<1x32xf32, #tpu.memory_space<any>>) target(%80 : memref<1x32xf32, #tpu.memory_space<vmem>>) target_semaphore(%arg5 : memref<!tpu.dma_semaphore, #tpu.memory_space<semaphore_mem>>)
    %c0_i32_48 = arith.constant 0 : i32
    %81 = tpu.memref_slice %arg3[%3, %c0_i32_48] : memref<64x32xf32, #tpu.memory_space<any>> -> memref<1x32xf32, #tpu.memory_space<any>>
    %c0_i32_49 = arith.constant 0 : i32
    %c0_i32_50 = arith.constant 0 : i32
    %82 = tpu.memref_slice %arg4[%c0_i32_49, %c0_i32_50] : memref<16x32xf32, #tpu.memory_space<vmem>> -> memref<1x32xf32, #tpu.memory_space<vmem>>
    tpu.wait_dma2 semaphore(%arg5 : memref<!tpu.dma_semaphore, #tpu.memory_space<semaphore_mem>>) src(%81 : memref<1x32xf32, #tpu.memory_space<any>>) dst(%82 : memref<1x32xf32, #tpu.memory_space<vmem>>)
    %c0_i32_51 = arith.constant 0 : i32
    %83 = tpu.memref_slice %arg3[%8, %c0_i32_51] : memref<64x32xf32, #tpu.memory_space<any>> -> memref<1x32xf32, #tpu.memory_space<any>>
    %c1_i32_52 = arith.constant 1 : i32
    %c0_i32_53 = arith.constant 0 : i32
    %84 = tpu.memref_slice %arg4[%c1_i32_52, %c0_i32_53] : memref<16x32xf32, #tpu.memory_space<vmem>> -> memref<1x32xf32, #tpu.memory_space<vmem>>
    tpu.wait_dma2 semaphore(%arg5 : memref<!tpu.dma_semaphore, #tpu.memory_space<semaphore_mem>>) src(%83 : memref<1x32xf32, #tpu.memory_space<any>>) dst(%84 : memref<1x32xf32, #tpu.memory_space<vmem>>)
    %c0_i32_54 = arith.constant 0 : i32
    %85 = tpu.memref_slice %arg3[%13, %c0_i32_54] : memref<64x32xf32, #tpu.memory_space<any>> -> memref<1x32xf32, #tpu.memory_space<any>>
    %c2_i32_55 = arith.constant 2 : i32
    %c0_i32_56 = arith.constant 0 : i32
    %86 = tpu.memref_slice %arg4[%c2_i32_55, %c0_i32_56] : memref<16x32xf32, #tpu.memory_space<vmem>> -> memref<1x32xf32, #tpu.memory_space<vmem>>
    tpu.wait_dma2 semaphore(%arg5 : memref<!tpu.dma_semaphore, #tpu.memory_space<semaphore_mem>>) src(%85 : memref<1x32xf32, #tpu.memory_space<any>>) dst(%86 : memref<1x32xf32, #tpu.memory_space<vmem>>)
    %c0_i32_57 = arith.constant 0 : i32
    %87 = tpu.memref_slice %arg3[%18, %c0_i32_57] : memref<64x32xf32, #tpu.memory_space<any>> -> memref<1x32xf32, #tpu.memory_space<any>>
    %c3_i32_58 = arith.constant 3 : i32
    %c0_i32_59 = arith.constant 0 : i32
    %88 = tpu.memref_slice %arg4[%c3_i32_58, %c0_i32_59] : memref<16x32xf32, #tpu.memory_space<vmem>> -> memref<1x32xf32, #tpu.memory_space<vmem>>
    tpu.wait_dma2 semaphore(%arg5 : memref<!tpu.dma_semaphore, #tpu.memory_space<semaphore_mem>>) src(%87 : memref<1x32xf32, #tpu.memory_space<any>>) dst(%88 : memref<1x32xf32, #tpu.memory_space<vmem>>)
    %c0_i32_60 = arith.constant 0 : i32
    %89 = tpu.memref_slice %arg3[%23, %c0_i32_60] : memref<64x32xf32, #tpu.memory_space<any>> -> memref<1x32xf32, #tpu.memory_space<any>>
    %c4_i32_61 = arith.constant 4 : i32
    %c0_i32_62 = arith.constant 0 : i32
    %90 = tpu.memref_slice %arg4[%c4_i32_61, %c0_i32_62] : memref<16x32xf32, #tpu.memory_space<vmem>> -> memref<1x32xf32, #tpu.memory_space<vmem>>
    tpu.wait_dma2 semaphore(%arg5 : memref<!tpu.dma_semaphore, #tpu.memory_space<semaphore_mem>>) src(%89 : memref<1x32xf32, #tpu.memory_space<any>>) dst(%90 : memref<1x32xf32, #tpu.memory_space<vmem>>)
    %c0_i32_63 = arith.constant 0 : i32
    %91 = tpu.memref_slice %arg3[%28, %c0_i32_63] : memref<64x32xf32, #tpu.memory_space<any>> -> memref<1x32xf32, #tpu.memory_space<any>>
    %c5_i32_64 = arith.constant 5 : i32
    %c0_i32_65 = arith.constant 0 : i32
    %92 = tpu.memref_slice %arg4[%c5_i32_64, %c0_i32_65] : memref<16x32xf32, #tpu.memory_space<vmem>> -> memref<1x32xf32, #tpu.memory_space<vmem>>
    tpu.wait_dma2 semaphore(%arg5 : memref<!tpu.dma_semaphore, #tpu.memory_space<semaphore_mem>>) src(%91 : memref<1x32xf32, #tpu.memory_space<any>>) dst(%92 : memref<1x32xf32, #tpu.memory_space<vmem>>)
    %c0_i32_66 = arith.constant 0 : i32
    %93 = tpu.memref_slice %arg3[%33, %c0_i32_66] : memref<64x32xf32, #tpu.memory_space<any>> -> memref<1x32xf32, #tpu.memory_space<any>>
    %c6_i32_67 = arith.constant 6 : i32
    %c0_i32_68 = arith.constant 0 : i32
    %94 = tpu.memref_slice %arg4[%c6_i32_67, %c0_i32_68] : memref<16x32xf32, #tpu.memory_space<vmem>> -> memref<1x32xf32, #tpu.memory_space<vmem>>
    tpu.wait_dma2 semaphore(%arg5 : memref<!tpu.dma_semaphore, #tpu.memory_space<semaphore_mem>>) src(%93 : memref<1x32xf32, #tpu.memory_space<any>>) dst(%94 : memref<1x32xf32, #tpu.memory_space<vmem>>)
    %c0_i32_69 = arith.constant 0 : i32
    %95 = tpu.memref_slice %arg3[%38, %c0_i32_69] : memref<64x32xf32, #tpu.memory_space<any>> -> memref<1x32xf32, #tpu.memory_space<any>>
    %c7_i32_70 = arith.constant 7 : i32
    %c0_i32_71 = arith.constant 0 : i32
    %96 = tpu.memref_slice %arg4[%c7_i32_70, %c0_i32_71] : memref<16x32xf32, #tpu.memory_space<vmem>> -> memref<1x32xf32, #tpu.memory_space<vmem>>
    tpu.wait_dma2 semaphore(%arg5 : memref<!tpu.dma_semaphore, #tpu.memory_space<semaphore_mem>>) src(%95 : memref<1x32xf32, #tpu.memory_space<any>>) dst(%96 : memref<1x32xf32, #tpu.memory_space<vmem>>)
    %c0_i32_72 = arith.constant 0 : i32
    %97 = tpu.memref_slice %arg3[%43, %c0_i32_72] : memref<64x32xf32, #tpu.memory_space<any>> -> memref<1x32xf32, #tpu.memory_space<any>>
    %c8_i32_73 = arith.constant 8 : i32
    %c0_i32_74 = arith.constant 0 : i32
    %98 = tpu.memref_slice %arg4[%c8_i32_73, %c0_i32_74] : memref<16x32xf32, #tpu.memory_space<vmem>> -> memref<1x32xf32, #tpu.memory_space<vmem>>
    tpu.wait_dma2 semaphore(%arg5 : memref<!tpu.dma_semaphore, #tpu.memory_space<semaphore_mem>>) src(%97 : memref<1x32xf32, #tpu.memory_space<any>>) dst(%98 : memref<1x32xf32, #tpu.memory_space<vmem>>)
    %c0_i32_75 = arith.constant 0 : i32
    %99 = tpu.memref_slice %arg3[%48, %c0_i32_75] : memref<64x32xf32, #tpu.memory_space<any>> -> memref<1x32xf32, #tpu.memory_space<any>>
    %c9_i32_76 = arith.constant 9 : i32
    %c0_i32_77 = arith.constant 0 : i32
    %100 = tpu.memref_slice %arg4[%c9_i32_76, %c0_i32_77] : memref<16x32xf32, #tpu.memory_space<vmem>> -> memref<1x32xf32, #tpu.memory_space<vmem>>
    tpu.wait_dma2 semaphore(%arg5 : memref<!tpu.dma_semaphore, #tpu.memory_space<semaphore_mem>>) src(%99 : memref<1x32xf32, #tpu.memory_space<any>>) dst(%100 : memref<1x32xf32, #tpu.memory_space<vmem>>)
    %c0_i32_78 = arith.constant 0 : i32
    %101 = tpu.memref_slice %arg3[%53, %c0_i32_78] : memref<64x32xf32, #tpu.memory_space<any>> -> memref<1x32xf32, #tpu.memory_space<any>>
    %c10_i32_79 = arith.constant 10 : i32
    %c0_i32_80 = arith.constant 0 : i32
    %102 = tpu.memref_slice %arg4[%c10_i32_79, %c0_i32_80] : memref<16x32xf32, #tpu.memory_space<vmem>> -> memref<1x32xf32, #tpu.memory_space<vmem>>
    tpu.wait_dma2 semaphore(%arg5 : memref<!tpu.dma_semaphore, #tpu.memory_space<semaphore_mem>>) src(%101 : memref<1x32xf32, #tpu.memory_space<any>>) dst(%102 : memref<1x32xf32, #tpu.memory_space<vmem>>)
    %c0_i32_81 = arith.constant 0 : i32
    %103 = tpu.memref_slice %arg3[%58, %c0_i32_81] : memref<64x32xf32, #tpu.memory_space<any>> -> memref<1x32xf32, #tpu.memory_space<any>>
    %c11_i32_82 = arith.constant 11 : i32
    %c0_i32_83 = arith.constant 0 : i32
    %104 = tpu.memref_slice %arg4[%c11_i32_82, %c0_i32_83] : memref<16x32xf32, #tpu.memory_space<vmem>> -> memref<1x32xf32, #tpu.memory_space<vmem>>
    tpu.wait_dma2 semaphore(%arg5 : memref<!tpu.dma_semaphore, #tpu.memory_space<semaphore_mem>>) src(%103 : memref<1x32xf32, #tpu.memory_space<any>>) dst(%104 : memref<1x32xf32, #tpu.memory_space<vmem>>)
    %c0_i32_84 = arith.constant 0 : i32
    %105 = tpu.memref_slice %arg3[%63, %c0_i32_84] : memref<64x32xf32, #tpu.memory_space<any>> -> memref<1x32xf32, #tpu.memory_space<any>>
    %c12_i32_85 = arith.constant 12 : i32
    %c0_i32_86 = arith.constant 0 : i32
    %106 = tpu.memref_slice %arg4[%c12_i32_85, %c0_i32_86] : memref<16x32xf32, #tpu.memory_space<vmem>> -> memref<1x32xf32, #tpu.memory_space<vmem>>
    tpu.wait_dma2 semaphore(%arg5 : memref<!tpu.dma_semaphore, #tpu.memory_space<semaphore_mem>>) src(%105 : memref<1x32xf32, #tpu.memory_space<any>>) dst(%106 : memref<1x32xf32, #tpu.memory_space<vmem>>)
    %c0_i32_87 = arith.constant 0 : i32
    %107 = tpu.memref_slice %arg3[%68, %c0_i32_87] : memref<64x32xf32, #tpu.memory_space<any>> -> memref<1x32xf32, #tpu.memory_space<any>>
    %c13_i32_88 = arith.constant 13 : i32
    %c0_i32_89 = arith.constant 0 : i32
    %108 = tpu.memref_slice %arg4[%c13_i32_88, %c0_i32_89] : memref<16x32xf32, #tpu.memory_space<vmem>> -> memref<1x32xf32, #tpu.memory_space<vmem>>
    tpu.wait_dma2 semaphore(%arg5 : memref<!tpu.dma_semaphore, #tpu.memory_space<semaphore_mem>>) src(%107 : memref<1x32xf32, #tpu.memory_space<any>>) dst(%108 : memref<1x32xf32, #tpu.memory_space<vmem>>)
    %c0_i32_90 = arith.constant 0 : i32
    %109 = tpu.memref_slice %arg3[%73, %c0_i32_90] : memref<64x32xf32, #tpu.memory_space<any>> -> memref<1x32xf32, #tpu.memory_space<any>>
    %c14_i32_91 = arith.constant 14 : i32
    %c0_i32_92 = arith.constant 0 : i32
    %110 = tpu.memref_slice %arg4[%c14_i32_91, %c0_i32_92] : memref<16x32xf32, #tpu.memory_space<vmem>> -> memref<1x32xf32, #tpu.memory_space<vmem>>
    tpu.wait_dma2 semaphore(%arg5 : memref<!tpu.dma_semaphore, #tpu.memory_space<semaphore_mem>>) src(%109 : memref<1x32xf32, #tpu.memory_space<any>>) dst(%110 : memref<1x32xf32, #tpu.memory_space<vmem>>)
    %c0_i32_93 = arith.constant 0 : i32
    %111 = tpu.memref_slice %arg3[%78, %c0_i32_93] : memref<64x32xf32, #tpu.memory_space<any>> -> memref<1x32xf32, #tpu.memory_space<any>>
    %c15_i32_94 = arith.constant 15 : i32
    %c0_i32_95 = arith.constant 0 : i32
    %112 = tpu.memref_slice %arg4[%c15_i32_94, %c0_i32_95] : memref<16x32xf32, #tpu.memory_space<vmem>> -> memref<1x32xf32, #tpu.memory_space<vmem>>
    tpu.wait_dma2 semaphore(%arg5 : memref<!tpu.dma_semaphore, #tpu.memory_space<semaphore_mem>>) src(%111 : memref<1x32xf32, #tpu.memory_space<any>>) dst(%112 : memref<1x32xf32, #tpu.memory_space<vmem>>)
    %c0 = arith.constant 0 : index
    %c0_96 = arith.constant 0 : index
    %113 = vector.load %arg2[%c0, %c0_96] : memref<16x1xi32, #tpu.memory_space<vmem>>, vector<16x1xi32>
    %c0_i32_97 = arith.constant 0 : i32
    %114 = vector.broadcast %c0_i32_97 : i32 to vector<16x1xi32>
    %115 = arith.cmpi sge, %113, %114 : vector<16x1xi32>
    %c64_i32 = arith.constant 64 : i32
    %116 = vector.broadcast %c64_i32 : i32 to vector<16x1xi32>
    %117 = arith.cmpi slt, %113, %116 : vector<16x1xi32>
    %118 = arith.andi %115, %117 : vector<16x1xi1>
    %c0_98 = arith.constant 0 : index
    %c0_99 = arith.constant 0 : index
    %119 = vector.load %arg4[%c0_98, %c0_99] : memref<16x32xf32, #tpu.memory_space<vmem>>, vector<16x32xf32>
    %cst = arith.constant 0.000000e+00 : f32
    %120 = vector.shape_cast %118 : vector<16x1xi1> to vector<16x1xi1>
    %121 = vector.broadcast %120 : vector<16x1xi1> to vector<16x32xi1>
    %122 = vector.broadcast %cst : f32 to vector<16x32xf32>
    %123 = arith.select %121, %119, %122 : vector<16x32xi1>, vector<16x32xf32>
    %c0_100 = arith.constant 0 : index
    %c0_101 = arith.constant 0 : index
    %124 = vector.load %arg4[%c0_100, %c0_101] : memref<16x32xf32, #tpu.memory_space<vmem>>, vector<16x32xf32>
    tpu.vector_store %arg4[%c0_100, %c0_101], %123 {strides = array<i32>} : memref<16x32xf32, #tpu.memory_space<vmem>>, vector<16x32xf32>,
    return
  }
  func.func @transform_0(%arg0: i32, %arg1: memref<16xi32, #tpu.memory_space<smem>>) -> (i32, i32) {
    %c0_i32 = arith.constant 0 : i32
    %c0_i32_0 = arith.constant 0 : i32
    return %arg0, %c0_i32 : i32, i32
  }
  func.func @transform_2(%arg0: i32, %arg1: memref<16xi32, #tpu.memory_space<smem>>) -> (i32, i32) {
    %c0_i32 = arith.constant 0 : i32
    %c0_i32_0 = arith.constant 0 : i32
    return %arg0, %c0_i32 : i32, i32
  }
}

</mosaic_0001>

<bundles_post_ra>
// kernel: embedding_forward.1
= control target key start
LH: loop header
LB: loop body
LE: loop exit
PB: predicated region body
PF: predicated region fallthrough
CT: control target
= control target key end

     0   :  { %s852_s15 = smov [#allocation4]   ;;  %s937_s0 = inlined_call_operand.vmem [shape: s32[16], index: 0, kind: input, shape index: {}]   ;;  %s938_s1 = inlined_call_operand.vmem [shape: s32[16,1], index: 1, kind: input, shape index: {}]   ;;  %s939_s2 = inlined_call_operand.vmem [shape: f32[64,32], index: 2, kind: input, shape index: {}]   ;;  %s940_s3 = inlined_call_operand.hbm [shape: f32[16,32], index: 3, kind: output, shape index: {}]  }
   0x1   :  { %s9_s14 = sshll.u32 %s937_s0, 4  ;;  %s10_s14 = int_to_ptr.vmem [resolvable:$true] %s9_s14 }
   0x2   :  { %12 = dma.vmem_to_smem %s10_s14, 16, %s852_s15, [#allocation3] }
   0x3   :  { %846 = dma.done.wait [#allocation3], 16 }
   0x4   :  { %847 = vsyncadd [#allocation3], 4294967280 }
   0x5   :  { %15 = sfence }
   0x6   :  { %16 = vsyncpa [#allocation6], 0  ;;  %s20_s16 = sld [smem:[#allocation4]] }
   0xc   :  { %s21_s19 = scalar_lea.vmem %s939_s2, %s20_s16 }
   0xd   :  { %v36_v0 = vld [vmem:[%s21_s19] sm:$0x1] }
   0xe   :  { %37 = vst [vmem:[#allocation5] sm:$0x1] %v36_v0 }
   0xf   :  { %55 = vsyncadd [#allocation2], 16  ;;  %s788_s20 = sld [smem:[#allocation4 + $0x1]] }
  0x15   :  { %s58_s0 = scalar_lea.vmem %s939_s2, %s788_s20 }
  0x16   :  { %v74_v1 = vld [vmem:[%s58_s0] sm:$0x1] }
  0x17   :  { %75 = vst [vmem:[#allocation5 + $0x1] sm:$0x1] %v74_v1 }
  0x18   :  { %93 = vsyncadd [#allocation2], 16  ;;  %s789_s23 = sld [smem:[#allocation4 + $0x2]] }
  0x1e   :  { %s96_s26 = scalar_lea.vmem %s939_s2, %s789_s23 }
  0x1f   :  { %v112_v2 = vld [vmem:[%s96_s26] sm:$0x1] }
  0x20   :  { %113 = vst [vmem:[#allocation5 + $0x2] sm:$0x1] %v112_v2 }
  0x21   :  { %131 = vsyncadd [#allocation2], 16  ;;  %s790_s27 = sld [smem:[#allocation4 + $0x3]] }
  0x27   :  { %s134_s30 = scalar_lea.vmem %s939_s2, %s790_s27 }
  0x28   :  { %v150_v3 = vld [vmem:[%s134_s30] sm:$0x1] }
  0x29   :  { %151 = vst [vmem:[#allocation5 + $0x3] sm:$0x1] %v150_v3 }
  0x2a   :  { %169 = vsyncadd [#allocation2], 16  ;;  %s791_s4 = sld [smem:[#allocation4 + $0x4]] }
  0x30   :  { %s172_s7 = scalar_lea.vmem %s939_s2, %s791_s4 }
  0x31   :  { %v188_v4 = vld [vmem:[%s172_s7] sm:$0x1] }
  0x32   :  { %189 = vst [vmem:[#allocation5 + $0x4] sm:$0x1] %v188_v4 }
  0x33   :  { %207 = vsyncadd [#allocation2], 16  ;;  %s792_s8 = sld [smem:[#allocation4 + $0x5]] }
  0x39   :  { %s210_s11 = scalar_lea.vmem %s939_s2, %s792_s8 }
  0x3a   :  { %v226_v5 = vld [vmem:[%s210_s11] sm:$0x1] }
  0x3b   :  { %227 = vst [vmem:[#allocation5 + $0x5] sm:$0x1] %v226_v5 }
  0x3c   :  { %245 = vsyncadd [#allocation2], 16  ;;  %s793_s12 = sld [smem:[#allocation4 + $0x6]] }
  0x42   :  { %s248_s15 = scalar_lea.vmem %s939_s2, %s793_s12 }
  0x43   :  { %v264_v6 = vld [vmem:[%s248_s15] sm:$0x1] }
  0x44   :  { %265 = vst [vmem:[#allocation5 + $0x6] sm:$0x1] %v264_v6 }
  0x45   :  { %283 = vsyncadd [#allocation2], 16  ;;  %s794_s16 = sld [smem:[#allocation4 + $0x7]] }
  0x4b   :  { %s286_s19 = scalar_lea.vmem %s939_s2, %s794_s16 }
  0x4c   :  { %v302_v7 = vld [vmem:[%s286_s19] sm:$0x1] }
  0x4d   :  { %303 = vst [vmem:[#allocation5 + $0x7] sm:$0x1] %v302_v7 }
  0x4e   :  { %321 = vsyncadd [#allocation2], 16  ;;  %s795_s20 = sld [smem:[#allocation4 + $0x8]] }
  0x54   :  { %s324_s0 = scalar_lea.vmem %s939_s2, %s795_s20 }
  0x55   :  { %v340_v8 = vld [vmem:[%s324_s0] sm:$0x1] }
  0x56   :  { %341 = vst [vmem:[#allocation5 + $0x8] sm:$0x1] %v340_v8 }
  0x57   :  { %359 = vsyncadd [#allocation2], 16  ;;  %s796_s23 = sld [smem:[#allocation4 + $0x9]] }
  0x5d   :  { %s362_s26 = scalar_lea.vmem %s939_s2, %s796_s23 }
  0x5e   :  { %v378_v9 = vld [vmem:[%s362_s26] sm:$0x1] }
  0x5f   :  { %379 = vst [vmem:[#allocation5 + $0x9] sm:$0x1] %v378_v9 }
  0x60   :  { %397 = vsyncadd [#allocation2], 16  ;;  %s797_s27 = sld [smem:[#allocation4 + $0xa]] }
  0x66   :  { %s400_s30 = scalar_lea.vmem %s939_s2, %s797_s27 }
  0x67   :  { %v416_v10 = vld [vmem:[%s400_s30] sm:$0x1] }
  0x68   :  { %417 = vst [vmem:[#allocation5 + $0xa] sm:$0x1] %v416_v10 }
  0x69   :  { %435 = vsyncadd [#allocation2], 16  ;;  %s798_s4 = sld [smem:[#allocation4 + $0xb]] }
  0x6f   :  { %s438_s7 = scalar_lea.vmem %s939_s2, %s798_s4 }
  0x70   :  { %v454_v11 = vld [vmem:[%s438_s7] sm:$0x1] }
  0x71   :  { %455 = vst [vmem:[#allocation5 + $0xb] sm:$0x1] %v454_v11 }
  0x72   :  { %473 = vsyncadd [#allocation2], 16  ;;  %s799_s8 = sld [smem:[#allocation4 + $0xc]] }
  0x78   :  { %s476_s11 = scalar_lea.vmem %s939_s2, %s799_s8 }
  0x79   :  { %v492_v12 = vld [vmem:[%s476_s11] sm:$0x1] }
  0x7a   :  { %493 = vst [vmem:[#allocation5 + $0xc] sm:$0x1] %v492_v12 }
  0x7b   :  { %511 = vsyncadd [#allocation2], 16  ;;  %s800_s12 = sld [smem:[#allocation4 + $0xd]] }
  0x81   :  { %s514_s15 = scalar_lea.vmem %s939_s2, %s800_s12 }
  0x82   :  { %v530_v13 = vld [vmem:[%s514_s15] sm:$0x1] }
  0x83   :  { %531 = vst [vmem:[#allocation5 + $0xd] sm:$0x1] %v530_v13 }
  0x84   :  { %549 = vsyncadd [#allocation2], 16  ;;  %s801_s16 = sld [smem:[#allocation4 + $0xe]] }
  0x8a   :  { %s552_s19 = scalar_lea.vmem %s939_s2, %s801_s16 }
  0x8b   :  { %v568_v14 = vld [vmem:[%s552_s19] sm:$0x1] }
  0x8c   :  { %569 = vst [vmem:[#allocation5 + $0xe] sm:$0x1] %v568_v14 }
  0x8d   :  { %587 = vsyncadd [#allocation2], 16  ;;  %s802_s20 = sld [smem:[#allocation4 + $0xf]] }
  0x93   :  { %s590_s0 = scalar_lea.vmem %s939_s2, %s802_s20 }
  0x94   :  { %v606_v15 = vld [vmem:[%s590_s0] sm:$0x1] }
  0x95   :  { %607 = vst [vmem:[#allocation5 + $0xf] sm:$0x1] %v606_v15 }
  0x96   :  { %625 = vsyncadd [#allocation2], 16 }
  0x97   :  { %848 = dma.done.wait [#allocation2], 256 }
  0x98   :  { %849 = vsyncadd [#allocation2], 4294967040  ;;  %v853_v16 = vmov 0   ;;  %v659_v17 = vld [vmem:[%s938_s1] sm:$0xff]  ;;  %v660_v18 = vld [vmem:[%s938_s1 + $0x8] sm:$0xff]  ;;  %vm681_vm6 = vcmask 261120  }
  0x99   :  { %809 = vset.pattern.permute.xlu0 %v853_v16  ;;  %vm661_vm0 = vcmp.ge.s32.totalorder %v659_v17, 0  ;;  %vm663_vm1 = vcmp.lt.s32.totalorder %v659_v17, 64  ;;  %vm662_vm3 = vcmp.ge.s32.totalorder %v660_v18, 0  ;;  %vm664_vm4 = vcmp.lt.s32.totalorder %v660_v18, 64  ;;  %v667_v21 = vld [vmem:[#allocation5] sm:$0xff]  ;;  %s854_s2 = smov [#allocation5]  }
  0x9a   :  { %vm665_vm2 = vmand %vm661_vm0, %vm663_vm1  ;;  %s688_s27 = sshll.u32 %s854_s2, 4  ;;  %s690_s29 = sshll.u32 %s940_s3, 4  ;;  %s689_s27 = int_to_ptr.vmem [resolvable:$true] %s688_s27  ;;  %s691_s29 = int_to_ptr.hbm [resolvable:$true] %s690_s29 }
  0x9b   :  { %v669_v19 = vsel %vm665_vm2, 1, %v853_v16  ;;  %vm666_vm5 = vmand %vm662_vm3, %vm664_vm4  ;;  %s855_s30 = smov 128   ;;  %s856_s4 = smov 8  }
  0x9c   :  { %672 = vperm.xlu0 %809, %v669_v19   ;;  %v670_v20 = vsel %vm666_vm5, 1, %v853_v16  ;;  %v668_v24 = vld [vmem:[#allocation5 + $0x8] sm:$0xff] }
  0xa4   :  { %675 = vperm.xlu0 %809, %v670_v20  }
 0x10e   :  { %v673_v22 = vpop.permute.xlu0 %672 }
 0x10f   :  { %vm677_vm7 = vcmp.eq.s32.totalorder %v673_v22, 1 }
 0x110   :  { %v679_v23 = vsel %vm677_vm7, %v667_v21, 0.0 }
 0x111   :  { %682 = vst.msk [vmem:[#allocation5] sm:$0xff] %vm681_vm6, %v679_v23 }
 0x116   :  { %v676_v25 = vpop.permute.xlu0 %675 }
 0x117   :  { %vm678_vm8 = vcmp.eq.s32.totalorder %v676_v25, 1 }
 0x118   :  { %v680_v26 = vsel %vm678_vm8, %v668_v24, 0.0 }
 0x119   :  { %683 = vst.msk [vmem:[#allocation5 + $0x8] sm:$0xff] %vm681_vm6, %v680_v26 }
 0x11a   :  { %696 = dma.vmem_to_hbm [thread:$0]  %s689_s27, 256, %s691_s29, [#allocation6], %s855_s30, %s855_s30, %s856_s4  }
 0x11b   :  { %850 = dma.done.wait [#allocation6], 256  }
 0x11c   :  { %851 = vsyncadd [#allocation6], 4294967040 }
 0x11d   :  { %701 = vsyncpa [#allocation6], 1 }
 0x11e   :  { %702 = vsyncmov [#allocation2] }
 0x121   :  { %s703_s5 = vpop.sfrf %702 }
 0x122   :  { %p803_p0 = scmp.ne.s32.totalorder %s703_s5, 0 }
 0x124   :  { %707 = shalt.err (%p803_p0)  }

</bundles_post_ra>
